<compile_context>
chip_gen: v7x
topology: tpu7x:2x2x1
jax: 0.10.0
libtpu: 0.0.40
codegen_flags: <defaults>
</compile_context>

<pallas_src>
import functools

import jax
import jax.numpy as jnp
from jax import lax
from jax.experimental import pallas as pl
from jax.experimental.pallas import tpu as pltpu

BN_EPS = 1e-5


def _make_tap_masks(H, W):
    """mask[t, y*W+x] = 1 iff tap t=(ky*3+kx) reads a valid (in-image) pixel."""
    ys = jnp.arange(H)
    xs = jnp.arange(W)
    rows = []
    for ky in range(3):
        for kx in range(3):
            dy, dx = ky - 1, kx - 1
            my = ((ys + dy) >= 0) & ((ys + dy) < H)
            mx = ((xs + dx) >= 0) & ((xs + dx) < W)
            rows.append((my[:, None] & mx[None, :]).reshape(H * W))
    return jnp.stack(rows, axis=0).astype(jnp.float32)          # (9, H*W)


def _conv_normal_kernel(*refs, H, W, c_in, c_inner, c_out, bottleneck):
    if bottleneck:
        (x_ref, w1_ref, s1_ref, b1_ref, w2_ref, s2_ref, b2_ref,
         mask_ref, out_ref, taps_ref) = refs
    else:
        (x_ref, w2_ref, s2_ref, b2_ref, mask_ref, out_ref, taps_ref) = refs

    P = H * W
    x = x_ref[0]                                   # (c_in, P) f32, lane-dense

    if bottleneck:
        # 1x1 conv == channel matmul on the MXU (bf16 operands, f32 accumulate)
        # followed by folded BN1 + ReLU.
        h = jnp.dot(w1_ref[...], x.astype(jnp.bfloat16),
                    preferred_element_type=jnp.float32)
        h = jnp.maximum(h * s1_ref[...] + b1_ref[...], 0.0)
    else:
        h = x                                      # c_inner == c_in

    # Build the (9*c_inner, P) tap matrix for the 3x3/s1/p1 conv: tap (ky,kx)
    # reads h at flat offset s = (ky-1)*W + (kx-1) (lane roll on the XLU) with
    # out-of-image positions zeroed by the precomputed masks.
    masks = mask_ref[...]                          # (9, P) f32
    for ky in range(3):
        for kx in range(3):
            t = ky * 3 + kx
            s = (ky - 1) * W + (kx - 1)
            if s == 0:
                tap = h                            # center tap: no shift, no mask
            else:
                tap = pltpu.roll(h, shift=(-s) % P, axis=1) * masks[t:t + 1, :]
            taps_ref[t * c_inner:(t + 1) * c_inner, :] = tap

    # Single fused MXU matmul: (c_out, 9*c_inner) x (9*c_inner, P).
    y = jnp.dot(w2_ref[...], taps_ref[...].astype(jnp.bfloat16),
                preferred_element_type=jnp.float32)
    y = jnp.maximum(y * s2_ref[...] + b2_ref[...], 0.0)   # folded BN2 + ReLU

    # Fused channel concat: out[:, :c_in] = x (passthrough), out[:, c_in:] = y.
    out_ref[0, 0:c_in, :] = x
    out_ref[0, c_in:c_in + c_out, :] = y


def conv_normal_forward(x_nchw, params, *, bottleneck):
    """ConvNormal.forward for a single (non-list) input tensor, NCHW in/out."""
    N, c_in, H, W = x_nchw.shape
    c_out, c_inner = params["conv2_w"].shape[0], params["conv2_w"].shape[1]
    P = H * W
    c_total = c_in + c_out

    def fold_bn(gamma, beta, mean, var):
        scale = gamma / jnp.sqrt(var + BN_EPS)
        return scale.astype(jnp.float32), (beta - mean * scale).astype(jnp.float32)

    # OIHW (c_out, c_inner, 3, 3) -> (c_out, 9*c_inner), col = (ky*3+kx)*c_inner + ci
    w2 = jnp.transpose(params["conv2_w"], (0, 2, 3, 1))
    w2 = w2.reshape(c_out, 9 * c_inner).astype(jnp.bfloat16)
    s2, b2 = fold_bn(params["gamma2"], params["beta2"],
                     params["mean2"], params["var2"])
    masks = _make_tap_masks(H, W)                              # (9, P)

    # Free reshape (no transpose, no concat): channels-major, spatial on lanes.
    x_flat = x_nchw.reshape(N, c_in, P).astype(jnp.float32)

    operands = [x_flat]
    in_specs = [pl.BlockSpec((1, c_in, P), lambda n: (n, 0, 0))]
    if bottleneck:
        w1 = params["conv1_w"][:, :, 0, 0].astype(jnp.bfloat16)   # (c_inner, c_in)
        s1, b1 = fold_bn(params["gamma1"], params["beta1"],
                         params["mean1"], params["var1"])
        operands += [w1, s1.reshape(c_inner, 1), b1.reshape(c_inner, 1)]
        in_specs += [
            pl.BlockSpec((c_inner, c_in), lambda n: (0, 0)),
            pl.BlockSpec((c_inner, 1), lambda n: (0, 0)),
            pl.BlockSpec((c_inner, 1), lambda n: (0, 0)),
        ]
    operands += [w2, s2.reshape(c_out, 1), b2.reshape(c_out, 1), masks]
    in_specs += [
        pl.BlockSpec((c_out, 9 * c_inner), lambda n: (0, 0)),
        pl.BlockSpec((c_out, 1), lambda n: (0, 0)),
        pl.BlockSpec((c_out, 1), lambda n: (0, 0)),
        pl.BlockSpec((9, P), lambda n: (0, 0)),
    ]

    kernel = functools.partial(_conv_normal_kernel, H=H, W=W, c_in=c_in,
                               c_inner=c_inner, c_out=c_out,
                               bottleneck=bottleneck)

    out_flat = pl.pallas_call(
        kernel,
        out_shape=jax.ShapeDtypeStruct((N, c_total, P), jnp.float32),
        grid_spec=pltpu.PrefetchScalarGridSpec(
            num_scalar_prefetch=0,
            grid=(N,),
            in_specs=in_specs,
            out_specs=pl.BlockSpec((1, c_total, P), lambda n: (n, 0, 0)),
            scratch_shapes=[pltpu.VMEM((9 * c_inner, P), jnp.float32)],
        ),
        compiler_params=pltpu.CompilerParams(dimension_semantics=("parallel",)),
    )(*operands)

    # torch.cat([x, conv_normal(x)], dim=1) already done in-kernel.
    return out_flat.reshape(N, c_total, H, W)


def _ref_forward(x, p, *, bottleneck):
    """Pure-JAX reference (eval-mode BN), NCHW."""
    def bn(y, g, b, m, v):
        rs = lambda t: t[None, :, None, None]
        return (y - rs(m)) / jnp.sqrt(rs(v) + BN_EPS) * rs(g) + rs(b)

    y = x
    if bottleneck:
        y = lax.conv_general_dilated(y, p["conv1_w"], (1, 1), "VALID",
                                     dimension_numbers=("NCHW", "OIHW", "NCHW"),
                                     precision=lax.Precision.HIGHEST)
        y = jnp.maximum(bn(y, p["gamma1"], p["beta1"], p["mean1"], p["var1"]), 0.0)
    y = lax.conv_general_dilated(y, p["conv2_w"], (1, 1), ((1, 1), (1, 1)),
                                 dimension_numbers=("NCHW", "OIHW", "NCHW"),
                                 precision=lax.Precision.HIGHEST)
    y = jnp.maximum(bn(y, p["gamma2"], p["beta2"], p["mean2"], p["var2"]), 0.0)
    return jnp.concatenate([x, y], axis=1)


if __name__ == "__main__":
    # ConvNormal(nIn=4, nOut=8, bottleneck=True, bnWidth=2)
    N, c_in, H, W = 2, 4, 16, 16
    c_out, bottleneck, bn_width = 8, True, 2
    c_inner = min(c_in, bn_width * c_out) if bottleneck else c_in

    ks = jax.random.split(jax.random.PRNGKey(0), 11)
    params = {
        "conv1_w": 0.3 * jax.random.normal(ks[0], (c_inner, c_in, 1, 1), jnp.float32),
        "gamma1": 1.0 + 0.1 * jax.random.normal(ks[1], (c_inner,), jnp.float32),
        "beta1": 0.1 * jax.random.normal(ks[2], (c_inner,), jnp.float32),
        "mean1": 0.1 * jax.random.normal(ks[3], (c_inner,), jnp.float32),
        "var1": jnp.abs(jax.random.normal(ks[4], (c_inner,), jnp.float32)) + 0.5,
        "conv2_w": 0.2 * jax.random.normal(ks[5], (c_out, c_inner, 3, 3), jnp.float32),
        "gamma2": 1.0 + 0.1 * jax.random.normal(ks[6], (c_out,), jnp.float32),
        "beta2": 0.1 * jax.random.normal(ks[7], (c_out,), jnp.float32),
        "mean2": 0.1 * jax.random.normal(ks[8], (c_out,), jnp.float32),
        "var2": jnp.abs(jax.random.normal(ks[9], (c_out,), jnp.float32)) + 0.5,
    }
    x = jax.random.normal(ks[10], (N, c_in, H, W), jnp.float32)

    out = jax.block_until_ready(conv_normal_forward(x, params, bottleneck=bottleneck))
    assert out.shape == (N, c_in + c_out, H, W), out.shape

    ref = jax.block_until_ready(_ref_forward(x, params, bottleneck=bottleneck))
    max_err = float(jnp.max(jnp.abs(out - ref)))
    assert jnp.allclose(out, ref, atol=2e-2, rtol=2e-2), max_err

    print("KERNEL_OK")
</pallas_src>

<mosaic_0001>
module attributes {stable_mosaic.version = 11 : i64} {
  func.func @_conv_normal_kernel(%arg0: i32, %arg1: memref<1x4x256xf32, #tpu.memory_space<vmem>>, %arg2: memref<4x4xbf16, #tpu.memory_space<vmem>>, %arg3: memref<4x1xf32, #tpu.memory_space<vmem>>, %arg4: memref<4x1xf32, #tpu.memory_space<vmem>>, %arg5: memref<8x36xbf16, #tpu.memory_space<vmem>>, %arg6: memref<8x1xf32, #tpu.memory_space<vmem>>, %arg7: memref<8x1xf32, #tpu.memory_space<vmem>>, %arg8: memref<9x256xf32, #tpu.memory_space<vmem>>, %arg9: memref<1x12x256xf32, #tpu.memory_space<vmem>>, %arg10: memref<36x256xf32, #tpu.memory_space<vmem>>) attributes {dimension_semantics = [#tpu.dimension_semantics<parallel>], iteration_bounds = array<i64: 2>, scalar_prefetch = 0 : i64, scratch_operands = 1 : i64, tpu.core_type = #tpu.core_type<tc>, window_params = [{transform_indices = @transform_0, window_bounds = array<i64: 1, 4, 256>}, {pipeline_mode = #tpu.pipeline_mode<synchronous>, transform_indices = @transform_1, window_bounds = array<i64: 4, 4>}, {pipeline_mode = #tpu.pipeline_mode<synchronous>, transform_indices = @transform_2, window_bounds = array<i64: 4, 1>}, {pipeline_mode = #tpu.pipeline_mode<synchronous>, transform_indices = @transform_3, window_bounds = array<i64: 4, 1>}, {pipeline_mode = #tpu.pipeline_mode<synchronous>, transform_indices = @transform_4, window_bounds = array<i64: 8, 36>}, {pipeline_mode = #tpu.pipeline_mode<synchronous>, transform_indices = @transform_5, window_bounds = array<i64: 8, 1>}, {pipeline_mode = #tpu.pipeline_mode<synchronous>, transform_indices = @transform_6, window_bounds = array<i64: 8, 1>}, {pipeline_mode = #tpu.pipeline_mode<synchronous>, transform_indices = @transform_7, window_bounds = array<i64: 9, 256>}, {transform_indices = @transform_8, window_bounds = array<i64: 1, 12, 256>}]} {
    %c0 = arith.constant 0 : index
    %c0_0 = arith.constant 0 : index
    %c0_1 = arith.constant 0 : index
    %0 = vector.load %arg1[%c0, %c0_0, %c0_1] : memref<1x4x256xf32, #tpu.memory_space<vmem>>, vector<1x4x256xf32>
    %1 = vector.shape_cast %0 : vector<1x4x256xf32> to vector<4x256xf32>
    %c0_2 = arith.constant 0 : index
    %c0_3 = arith.constant 0 : index
    %2 = vector.load %arg2[%c0_2, %c0_3] : memref<4x4xbf16, #tpu.memory_space<vmem>>, vector<4x4xbf16>
    %3 = arith.truncf %1 : vector<4x256xf32> to vector<4x256xbf16>
    %cst = arith.constant dense<0.000000e+00> : vector<4x256xf32>
    %4 = tpu.matmul %2, %3, %cst {dimension_numbers = #tpu.dot_dimension_numbers<[1], [0], [0], [1], [0, 0, 1, 1], [], []>} : vector<4x4xbf16>, vector<4x256xbf16>, vector<4x256xf32> -> vector<4x256xf32>
    %c0_4 = arith.constant 0 : index
    %c0_5 = arith.constant 0 : index
    %5 = vector.load %arg3[%c0_4, %c0_5] : memref<4x1xf32, #tpu.memory_space<vmem>>, vector<4x1xf32>
    %6 = vector.broadcast %5 : vector<4x1xf32> to vector<4x256xf32>
    %7 = arith.mulf %4, %6 : vector<4x256xf32>
    %c0_6 = arith.constant 0 : index
    %c0_7 = arith.constant 0 : index
    %8 = vector.load %arg4[%c0_6, %c0_7] : memref<4x1xf32, #tpu.memory_space<vmem>>, vector<4x1xf32>
    %9 = vector.broadcast %8 : vector<4x1xf32> to vector<4x256xf32>
    %10 = arith.addf %7, %9 : vector<4x256xf32>
    %cst_8 = arith.constant 0.000000e+00 : f32
    %11 = vector.broadcast %cst_8 : f32 to vector<4x256xf32>
    %12 = arith.maximumf %10, %11 : vector<4x256xf32>
    %c0_9 = arith.constant 0 : index
    %c0_10 = arith.constant 0 : index
    %13 = vector.load %arg8[%c0_9, %c0_10] : memref<9x256xf32, #tpu.memory_space<vmem>>, vector<9x256xf32>
    %c17_i32 = arith.constant 17 : i32
    %14 = tpu.dynamic_rotate %12 by %c17_i32 dim 1 : vector<4x256xf32>, i32 -> vector<4x256xf32>
    %15 = vector.extract_strided_slice %13 {offsets = [0, 0], sizes = [1, 256], strides = [1, 1]} : vector<9x256xf32> to vector<1x256xf32>
    %16 = vector.broadcast %15 : vector<1x256xf32> to vector<4x256xf32>
    %17 = arith.mulf %14, %16 : vector<4x256xf32>
    %c0_11 = arith.constant 0 : index
    %c0_12 = arith.constant 0 : index
    %18 = vector.load %arg10[%c0_11, %c0_12] : memref<36x256xf32, #tpu.memory_space<vmem>>, vector<4x256xf32>
    tpu.vector_store %arg10[%c0_11, %c0_12], %17 {strides = array<i32>} : memref<36x256xf32, #tpu.memory_space<vmem>>, vector<4x256xf32>,
    %c16_i32 = arith.constant 16 : i32
    %19 = tpu.dynamic_rotate %12 by %c16_i32 dim 1 : vector<4x256xf32>, i32 -> vector<4x256xf32>
    %20 = vector.extract_strided_slice %13 {offsets = [1, 0], sizes = [1, 256], strides = [1, 1]} : vector<9x256xf32> to vector<1x256xf32>
    %21 = vector.broadcast %20 : vector<1x256xf32> to vector<4x256xf32>
    %22 = arith.mulf %19, %21 : vector<4x256xf32>
    %c4 = arith.constant 4 : index
    %c0_13 = arith.constant 0 : index
    %23 = vector.load %arg10[%c4, %c0_13] : memref<36x256xf32, #tpu.memory_space<vmem>>, vector<4x256xf32>
    tpu.vector_store %arg10[%c4, %c0_13], %22 {strides = array<i32>} : memref<36x256xf32, #tpu.memory_space<vmem>>, vector<4x256xf32>,
    %c15_i32 = arith.constant 15 : i32
    %24 = tpu.dynamic_rotate %12 by %c15_i32 dim 1 : vector<4x256xf32>, i32 -> vector<4x256xf32>
    %25 = vector.extract_strided_slice %13 {offsets = [2, 0], sizes = [1, 256], strides = [1, 1]} : vector<9x256xf32> to vector<1x256xf32>
    %26 = vector.broadcast %25 : vector<1x256xf32> to vector<4x256xf32>
    %27 = arith.mulf %24, %26 : vector<4x256xf32>
    %c8 = arith.constant 8 : index
    %c0_14 = arith.constant 0 : index
    %28 = vector.load %arg10[%c8, %c0_14] : memref<36x256xf32, #tpu.memory_space<vmem>>, vector<4x256xf32>
    tpu.vector_store %arg10[%c8, %c0_14], %27 {strides = array<i32>} : memref<36x256xf32, #tpu.memory_space<vmem>>, vector<4x256xf32>,
    %c1_i32 = arith.constant 1 : i32
    %29 = tpu.dynamic_rotate %12 by %c1_i32 dim 1 : vector<4x256xf32>, i32 -> vector<4x256xf32>
    %30 = vector.extract_strided_slice %13 {offsets = [3, 0], sizes = [1, 256], strides = [1, 1]} : vector<9x256xf32> to vector<1x256xf32>
    %31 = vector.broadcast %30 : vector<1x256xf32> to vector<4x256xf32>
    %32 = arith.mulf %29, %31 : vector<4x256xf32>
    %c12 = arith.constant 12 : index
    %c0_15 = arith.constant 0 : index
    %33 = vector.load %arg10[%c12, %c0_15] : memref<36x256xf32, #tpu.memory_space<vmem>>, vector<4x256xf32>
    tpu.vector_store %arg10[%c12, %c0_15], %32 {strides = array<i32>} : memref<36x256xf32, #tpu.memory_space<vmem>>, vector<4x256xf32>,
    %c16 = arith.constant 16 : index
    %c0_16 = arith.constant 0 : index
    %34 = vector.load %arg10[%c16, %c0_16] : memref<36x256xf32, #tpu.memory_space<vmem>>, vector<4x256xf32>
    tpu.vector_store %arg10[%c16, %c0_16], %12 {strides = array<i32>} : memref<36x256xf32, #tpu.memory_space<vmem>>, vector<4x256xf32>,
    %c255_i32 = arith.constant 255 : i32
    %35 = tpu.dynamic_rotate %12 by %c255_i32 dim 1 : vector<4x256xf32>, i32 -> vector<4x256xf32>
    %36 = vector.extract_strided_slice %13 {offsets = [5, 0], sizes = [1, 256], strides = [1, 1]} : vector<9x256xf32> to vector<1x256xf32>
    %37 = vector.broadcast %36 : vector<1x256xf32> to vector<4x256xf32>
    %38 = arith.mulf %35, %37 : vector<4x256xf32>
    %c20 = arith.constant 20 : index
    %c0_17 = arith.constant 0 : index
    %39 = vector.load %arg10[%c20, %c0_17] : memref<36x256xf32, #tpu.memory_space<vmem>>, vector<4x256xf32>
    tpu.vector_store %arg10[%c20, %c0_17], %38 {strides = array<i32>} : memref<36x256xf32, #tpu.memory_space<vmem>>, vector<4x256xf32>,
    %c241_i32 = arith.constant 241 : i32
    %40 = tpu.dynamic_rotate %12 by %c241_i32 dim 1 : vector<4x256xf32>, i32 -> vector<4x256xf32>
    %41 = vector.extract_strided_slice %13 {offsets = [6, 0], sizes = [1, 256], strides = [1, 1]} : vector<9x256xf32> to vector<1x256xf32>
    %42 = vector.broadcast %41 : vector<1x256xf32> to vector<4x256xf32>
    %43 = arith.mulf %40, %42 : vector<4x256xf32>
    %c24 = arith.constant 24 : index
    %c0_18 = arith.constant 0 : index
    %44 = vector.load %arg10[%c24, %c0_18] : memref<36x256xf32, #tpu.memory_space<vmem>>, vector<4x256xf32>
    tpu.vector_store %arg10[%c24, %c0_18], %43 {strides = array<i32>} : memref<36x256xf32, #tpu.memory_space<vmem>>, vector<4x256xf32>,
    %c240_i32 = arith.constant 240 : i32
    %45 = tpu.dynamic_rotate %12 by %c240_i32 dim 1 : vector<4x256xf32>, i32 -> vector<4x256xf32>
    %46 = vector.extract_strided_slice %13 {offsets = [7, 0], sizes = [1, 256], strides = [1, 1]} : vector<9x256xf32> to vector<1x256xf32>
    %47 = vector.broadcast %46 : vector<1x256xf32> to vector<4x256xf32>
    %48 = arith.mulf %45, %47 : vector<4x256xf32>
    %c28 = arith.constant 28 : index
    %c0_19 = arith.constant 0 : index
    %49 = vector.load %arg10[%c28, %c0_19] : memref<36x256xf32, #tpu.memory_space<vmem>>, vector<4x256xf32>
    tpu.vector_store %arg10[%c28, %c0_19], %48 {strides = array<i32>} : memref<36x256xf32, #tpu.memory_space<vmem>>, vector<4x256xf32>,
    %c239_i32 = arith.constant 239 : i32
    %50 = tpu.dynamic_rotate %12 by %c239_i32 dim 1 : vector<4x256xf32>, i32 -> vector<4x256xf32>
    %51 = vector.extract_strided_slice %13 {offsets = [8, 0], sizes = [1, 256], strides = [1, 1]} : vector<9x256xf32> to vector<1x256xf32>
    %52 = vector.broadcast %51 : vector<1x256xf32> to vector<4x256xf32>
    %53 = arith.mulf %50, %52 : vector<4x256xf32>
    %c32 = arith.constant 32 : index
    %c0_20 = arith.constant 0 : index
    %54 = vector.load %arg10[%c32, %c0_20] : memref<36x256xf32, #tpu.memory_space<vmem>>, vector<4x256xf32>
    tpu.vector_store %arg10[%c32, %c0_20], %53 {strides = array<i32>} : memref<36x256xf32, #tpu.memory_space<vmem>>, vector<4x256xf32>,
    %c0_21 = arith.constant 0 : index
    %c0_22 = arith.constant 0 : index
    %55 = vector.load %arg5[%c0_21, %c0_22] : memref<8x36xbf16, #tpu.memory_space<vmem>>, vector<8x36xbf16>
    %c0_23 = arith.constant 0 : index
    %c0_24 = arith.constant 0 : index
    %56 = vector.load %arg10[%c0_23, %c0_24] : memref<36x256xf32, #tpu.memory_space<vmem>>, vector<36x256xf32>
    %57 = arith.truncf %56 : vector<36x256xf32> to vector<36x256xbf16>
    %cst_25 = arith.constant dense<0.000000e+00> : vector<8x256xf32>
    %58 = tpu.matmul %55, %57, %cst_25 {dimension_numbers = #tpu.dot_dimension_numbers<[1], [0], [0], [1], [0, 0, 1, 1], [], []>} : vector<8x36xbf16>, vector<36x256xbf16>, vector<8x256xf32> -> vector<8x256xf32>
    %c0_26 = arith.constant 0 : index
    %c0_27 = arith.constant 0 : index
    %59 = vector.load %arg6[%c0_26, %c0_27] : memref<8x1xf32, #tpu.memory_space<vmem>>, vector<8x1xf32>
    %60 = vector.broadcast %59 : vector<8x1xf32> to vector<8x256xf32>
    %61 = arith.mulf %58, %60 : vector<8x256xf32>
    %c0_28 = arith.constant 0 : index
    %c0_29 = arith.constant 0 : index
    %62 = vector.load %arg7[%c0_28, %c0_29] : memref<8x1xf32, #tpu.memory_space<vmem>>, vector<8x1xf32>
    %63 = vector.broadcast %62 : vector<8x1xf32> to vector<8x256xf32>
    %64 = arith.addf %61, %63 : vector<8x256xf32>
    %cst_30 = arith.constant 0.000000e+00 : f32
    %65 = vector.broadcast %cst_30 : f32 to vector<8x256xf32>
    %66 = arith.maximumf %64, %65 : vector<8x256xf32>
    %c0_31 = arith.constant 0 : index
    %c0_32 = arith.constant 0 : index
    %c0_33 = arith.constant 0 : index
    %67 = vector.load %arg9[%c0_31, %c0_32, %c0_33] : memref<1x12x256xf32, #tpu.memory_space<vmem>>, vector<1x4x256xf32>
    %68 = vector.shape_cast %67 : vector<1x4x256xf32> to vector<4x256xf32>
    %69 = vector.shape_cast %1 : vector<4x256xf32> to vector<1x4x256xf32>
    tpu.vector_store %arg9[%c0_31, %c0_32, %c0_33], %69 {strides = array<i32>} : memref<1x12x256xf32, #tpu.memory_space<vmem>>, vector<1x4x256xf32>,
    %c0_34 = arith.constant 0 : index
    %c4_35 = arith.constant 4 : index
    %c0_36 = arith.constant 0 : index
    %70 = vector.load %arg9[%c0_34, %c4_35, %c0_36] : memref<1x12x256xf32, #tpu.memory_space<vmem>>, vector<1x8x256xf32>
    %71 = vector.shape_cast %70 : vector<1x8x256xf32> to vector<8x256xf32>
    %72 = vector.shape_cast %66 : vector<8x256xf32> to vector<1x8x256xf32>
    tpu.vector_store %arg9[%c0_34, %c4_35, %c0_36], %72 {strides = array<i32>} : memref<1x12x256xf32, #tpu.memory_space<vmem>>, vector<1x8x256xf32>,
    return
  }
  func.func @transform_0(%arg0: i32) -> (i32, i32, i32) {
    %c0_i32 = arith.constant 0 : i32
    %c0_i32_0 = arith.constant 0 : i32
    %c0_i32_1 = arith.constant 0 : i32
    return %arg0, %c0_i32, %c0_i32_0 : i32, i32, i32
  }
  func.func @transform_1(%arg0: i32) -> (i32, i32) {
    %c0_i32 = arith.constant 0 : i32
    %c0_i32_0 = arith.constant 0 : i32
    %c0_i32_1 = arith.constant 0 : i32
    return %c0_i32, %c0_i32_0 : i32, i32
  }
  func.func @transform_2(%arg0: i32) -> (i32, i32) {
    %c0_i32 = arith.constant 0 : i32
    %c0_i32_0 = arith.constant 0 : i32
    %c0_i32_1 = arith.constant 0 : i32
    return %c0_i32, %c0_i32_0 : i32, i32
  }
  func.func @transform_3(%arg0: i32) -> (i32, i32) {
    %c0_i32 = arith.constant 0 : i32
    %c0_i32_0 = arith.constant 0 : i32
    %c0_i32_1 = arith.constant 0 : i32
    return %c0_i32, %c0_i32_0 : i32, i32
  }
  func.func @transform_4(%arg0: i32) -> (i32, i32) {
    %c0_i32 = arith.constant 0 : i32
    %c0_i32_0 = arith.constant 0 : i32
    %c0_i32_1 = arith.constant 0 : i32
    return %c0_i32, %c0_i32_0 : i32, i32
  }
  func.func @transform_5(%arg0: i32) -> (i32, i32) {
    %c0_i32 = arith.constant 0 : i32
    %c0_i32_0 = arith.constant 0 : i32
    %c0_i32_1 = arith.constant 0 : i32
    return %c0_i32, %c0_i32_0 : i32, i32
  }
  func.func @transform_6(%arg0: i32) -> (i32, i32) {
    %c0_i32 = arith.constant 0 : i32
    %c0_i32_0 = arith.constant 0 : i32
    %c0_i32_1 = arith.constant 0 : i32
    return %c0_i32, %c0_i32_0 : i32, i32
  }
  func.func @transform_7(%arg0: i32) -> (i32, i32) {
    %c0_i32 = arith.constant 0 : i32
    %c0_i32_0 = arith.constant 0 : i32
    %c0_i32_1 = arith.constant 0 : i32
    return %c0_i32, %c0_i32_0 : i32, i32
  }
  func.func @transform_8(%arg0: i32) -> (i32, i32, i32) {
    %c0_i32 = arith.constant 0 : i32
    %c0_i32_0 = arith.constant 0 : i32
    %c0_i32_1 = arith.constant 0 : i32
    return %arg0, %c0_i32, %c0_i32_0 : i32, i32, i32
  }
}

</mosaic_0001>

<bundles_post_ra>
// kernel: tpu_custom_call.1
= control target key start
LH: loop header
LB: loop body
LE: loop exit
PB: predicated region body
PF: predicated region fallthrough
CT: control target
= control target key end

     0   :  { %s822_s27 = smov 0   ;;  %s920_s0 = inlined_call_operand.vmem [shape: f32[2,4,256], index: 0, kind: input, shape index: {}]   ;;  %s921_s1 = inlined_call_operand.vmem [shape: bf16[4,4], index: 1, kind: input, shape index: {}]   ;;  %s922_s2 = inlined_call_operand.vmem [shape: f32[4,1], index: 2, kind: input, shape index: {}]   ;;  %s923_s3 = inlined_call_operand.vmem [shape: f32[4,1], index: 3, kind: input, shape index: {}]   ;;  %s924_s4 = inlined_call_operand.vmem [shape: bf16[8,36], index: 4, kind: input, shape index: {}]   ;;  %s925_s5 = inlined_call_operand.vmem [shape: f32[8,1], index: 5, kind: input, shape index: {}]   ;;  %s926_s6 = inlined_call_operand.vmem [shape: f32[8,1], index: 6, kind: input, shape index: {}]   ;;  %s927_s7 = inlined_call_operand.vmem [shape: f32[9,256], index: 7, kind: input, shape index: {}]   ;;  %s928_s8 = inlined_call_operand.vmem [shape: f32[2,12,256], index: 8, kind: output, shape index: {}]  }
   0x1 LB: > { %s721_s28 = sadd.s32 4294967295, %s766_s27   ;;  %p725_p0 = scmp.ge.s32.totalorder %s766_s27, 1  ;;  %s766_s27 = sphi %s822_s27, %s18_s27  }
   0x2   : > { %p262_p1 = scmp.lt.s32.totalorder %s766_s27, 3 }
   0x4   : > { %p263_p2 = pnand %p725_p0, %p262_p1 }
   0x5   : > { %p296_p3 = scmp.lt.s32.totalorder (!%p263_p2), %s721_s28, 1  ;;  %v768_v0 = vmov (!%p263_p2), 0   ;;  %v366_v1 = vld [vmem:[%s922_s2] sm:$0xf] (!%p263_p2)  ;;  %vm318_vm0 = vcmask (!%p263_p2), 1041408   ;;  %vm314_vm1 = vcmask (!%p263_p2), 31744   ;;  %v392_v23 = vlaneseq (!%p263_p2) }
   0x6   : > { %266 = sbr.rel (%p263_p2) target bundleno = 629 (0x275), region = 52  ;;  %357 = vmatprep.mubr.bf16.mxu0 (!%p263_p2), %v768_v0  ;;  %757 = vset.pattern.permute.xlu0 (!%p263_p2), %v768_v0  ;;  %v374_v2 = vld [vmem:[%s923_s3] sm:$0xf] (!%p263_p2)  ;;  %s769_s21 = smov (!%p263_p2), 1   ;;  %v870_v28 = vld [vmem:[%s927_s7 + $0x8] sm:$0xff] (!%p263_p2)  ;;  %vm585_vm10 = vcmask (!%p263_p2), 293888  }
   0x7   : > { %369 = vperm.xlu0 (!%p263_p2), %757, %v366_v1   ;;  %627 = vmatprep.mubr.bf16.mxu1 (!%p263_p2), %v768_v0  ;;  %v308_v8 = vld [vmem:[%s921_s1] sm:$0x3] (!%p263_p2)  ;;  %s770_s22 = smov (!%p263_p2), 16   ;;  %s771_s23 = smov (!%p263_p2), 17   ;;  %v857_v24 = vshrl.u32 (!%p263_p2), %v392_v23, 7  ;;  %v859_v25 = vand.u32 (!%p263_p2), 127, %v392_v23 }
   0x8   : > { %758 = vset.pattern.permute.xlu1 (!%p263_p2), %v768_v0  ;;  %s772_s24 = smov (!%p263_p2), 15   ;;  %s773_s25 = smov (!%p263_p2), 127   ;;  %v636_v21 = vld [vmem:[%s925_s5] sm:$0xff] (!%p263_p2) }
   0x9   : > { %s774_s26 = smov (!%p263_p2), 112   ;;  %s776_s29 = smov (!%p263_p2), 111   ;;  %v644_v22 = vld [vmem:[%s926_s6] sm:$0xff] (!%p263_p2)  ;;  %v418_v26 = vsub.s32 (!%p263_p2), 1, %v857_v24  ;;  %v462_v31 = vsub.s32 (!%p263_p2), 3, %v857_v24  ;;  %vm413_vm2 = vcmp.lt.s32.totalorder (!%p263_p2), %v859_v25, 16 }
   0xa   : > { %v865_v27 = vld [vmem:[%s927_s7] sm:$0xff] (!%p263_p2)  ;;  %vm457_vm3 = vcmp.lt.s32.totalorder (!%p263_p2), %v859_v25, 1  ;;  %v399_v42 = vsub.s32 (!%p263_p2), 0, %v857_v24  ;;  %vm394_vm4 = vcmp.lt.s32.totalorder (!%p263_p2), %v859_v25, 17  ;;  %v443_v49 = vsub.s32 (!%p263_p2), 2, %v857_v24 }
   0xb   : > { %377 = vperm.xlu0 (!%p263_p2), %757, %v374_v2   ;;  %v419_v32 = vrot.slane (!%p263_p2), %v865_v27, %v418_v26  ;;  %v423_v33 = vrot.slane (!%p263_p2), %v870_v28, %v418_v26  ;;  %v463_v38 = vrot.slane (!%p263_p2), %v865_v27, %v462_v31  ;;  %v467_v41 = vrot.slane (!%p263_p2), %v870_v28, %v462_v31 }
   0xc   : > { %v400_v52 = vrot.slane (!%p263_p2), %v865_v27, %v399_v42  ;;  %v404_v53 = vrot.slane (!%p263_p2), %v870_v28, %v399_v42  ;;  %vm438_vm5 = vcmp.lt.s32.totalorder (!%p263_p2), %v859_v25, 15  ;;  %v444_v59 = vrot.slane (!%p263_p2), %v865_v27, %v443_v49 }
   0xd   : > { %s930_s28 = smov (!%p296_p3, %s721_s28), 1  ;;  %v448_v63 = vrot.slane %v870_v28, %v443_v49  ;;  %v489_v0 = vsub.s32 5, %v857_v24  ;;  %vm484_vm6 = vcmp.lt.s32.totalorder %v859_v25, 127  ;;  %vm528_vm7 = vcmp.lt.s32.totalorder %v859_v25, 112 }
   0xe   : > { %s738_s11 = sshll.u32 %s930_s28, 3  ;;  %s739_s12 = sshll.u32 %s930_s28, 5  ;;  %vm509_vm8 = vcmp.lt.s32.totalorder %v859_v25, 113  ;;  %vm553_vm9 = vcmp.lt.s32.totalorder %v859_v25, 111 }
   0xf   : > { %s300_s15 = scalar_lea.vmem %s920_s0, %s738_s11  ;;  %s842_s18 = scalar_lea.vmem %s928_s8, %s739_s12 }
  0x10   : > { %v307_v3 = vld [vmem:[%s300_s15] sm:$0xff]  ;;  %s775_s28 = smov 113  }
  0x11   : > { %v310_v4 = vcombine.high %v307_v3, %v307_v3  ;;  %654 = vst [vmem:[%s842_s18] sm:$0xf] %v307_v3  ;;  %v312_v5 = vpack.c.bf16 %v307_v3, %v307_v3 }
  0x13   : > { %v313_v6 = vpack.c.bf16 %v310_v4, %v310_v4  ;;  %655 = vst [vmem:[%s842_s18 + $0x8] sm:$0xf] %v310_v4  ;;  %v320_v7 = vsel %vm318_vm0, %v312_v5, 0  ;;  %v533_v4 = vsub.s32 7, %v857_v24 }
  0x15   : > { %730 = vmatprep.subr.msk.bf16.mxu0 %vm318_vm0, %v313_v6 }
  0x16   : > { %326 = vmatpush1.bf16.msra.mxu0 %v320_v7  ;;  %v490_v7 = vrot.slane %v865_v27, %v489_v0 }
  0x19   : > { %731 = vmatmul.mubr.msk.bf16.vlgmr.msra.gmra.mrb[0].mxu0 %vm314_vm1, %v308_v8  ;;  %v494_v8 = vrot.slane %v870_v28, %v489_v0 }
  0x86   : > { %v370_v9 = vpop.permute.xlu0 %369 }
  0x8a   : > { %v378_v13 = vpop.permute.xlu0 %377 }
  0xec   : > { %v359_v10 = vpop.f32.mrb[0].mxu0 }
  0xed   : > { %v372_v11 = vmul.f32 %v370_v9, %v359_v10  ;;  %v361_v12 = vpop.f32.mrb[1].mxu0 }
  0xee   : > { %v373_v14 = vmul.f32 %v370_v9, %v361_v12  ;;  %v363_v15 = vpop.f32.mrb[2].mxu0 }
  0xef   : > { %v380_v16 = vadd.f32 %v378_v13, %v372_v11  ;;  %v364_v17 = vpop.f32.mrb[3].mxu0 }
  0xf0   : > { %v381_v18 = vadd.f32 %v378_v13, %v373_v14  ;;  %v534_v13 = vrot.slane %v865_v27, %v533_v4  ;;  %v514_v17 = vsub.s32 6, %v857_v24 }
  0xf1   : > { %v382_v19 = vmax.f32 %v380_v16, 0.0  ;;  %v538_v16 = vrot.slane %v870_v28, %v533_v4 }
  0xf2   : > { %v383_v20 = vmax.f32 %v381_v18, 0.0  ;;  %v519_v31 = vrot.slane %v870_v28, %v514_v17  ;;  %v732_v28 = vld [vmem:[%s927_s7 + $0x10] ss:$0 sm:$0xff] }
  0xf3   : > { %478 = vst [vmem:[#allocation2 + $0x20] sm:$0xf] %v382_v19  ;;  %453 = vrot.lane.b32.xlu0 %v382_v19, %s769_s21  ;;  %409 = vrot.lane.b32.xlu1 %v382_v19, %s770_s22 }
  0xf4   : > { %479 = vst [vmem:[#allocation2 + $0x28] sm:$0xf] %v383_v20 }
  0xf7   : > { %388 = vrot.lane.b32.xlu0 %v382_v19, %s771_s23  ;;  %411 = vrot.lane.b32.xlu1 %v383_v20, %s770_s22 }
  0xfb   : > { %434 = vrot.lane.b32.xlu0 %v382_v19, %s772_s24  ;;  %455 = vrot.lane.b32.xlu1 %v383_v20, %s769_s21 }
  0xff   : > { %480 = vrot.lane.b32.xlu0 %v382_v19, %s773_s25  ;;  %390 = vrot.lane.b32.xlu1 %v383_v20, %s771_s23 }
 0x103   : > { %524 = vrot.lane.b32.xlu0 %v382_v19, %s774_s26  ;;  %436 = vrot.lane.b32.xlu1 %v383_v20, %s772_s24 }
 0x107   : > { %505 = vrot.lane.b32.xlu0 %v382_v19, %s775_s28  ;;  %482 = vrot.lane.b32.xlu1 %v383_v20, %s773_s25 }
 0x10b   : > { %549 = vrot.lane.b32.xlu0 %v382_v19, %s776_s29  ;;  %526 = vrot.lane.b32.xlu1 %v383_v20, %s774_s26 }
 0x10f   : > { %639 = vperm.xlu0 %757, %v636_v21   ;;  %507 = vrot.lane.b32.xlu1 %v383_v20, %s775_s28 }
 0x113   : > { %551 = vrot.lane.b32.xlu1 %v383_v20, %s776_s29 }
 0x117   : > { %647 = vperm.xlu1 %758, %v644_v22  }
 0x165   : > { %v454_v29 = vpop.permute.xlu0 %453  ;;  %v410_v30 = vpop.permute.xlu1 %409 }
 0x169   : > { %v389_v34 = vpop.permute.xlu0 %388  ;;  %v412_v35 = vpop.permute.xlu1 %411 }
 0x16a   : > { %v414_v36 = vsel %vm413_vm2, %v410_v30, %v412_v35  ;;  %v415_v37 = vsel %vm413_vm2, %v412_v35, %v410_v30  ;;  %v515_v30 = vrot.slane %v865_v27, %v514_v17 }
 0x16b   : > { %v424_v39 = vmul.f32 %v419_v32, %v415_v37  ;;  %v425_v40 = vmul.f32 %v423_v33, %v414_v36 }
 0x16d   : > { %v428_v43 = vrot.slane %v424_v39, 4  ;;  %v429_v44 = vrot.slane %v425_v40, 4  ;;  %v435_v45 = vpop.permute.xlu0 %434  ;;  %v456_v46 = vpop.permute.xlu1 %455 }
 0x16e   : > { %v458_v47 = vsel %vm457_vm3, %v454_v29, %v456_v46  ;;  %v459_v48 = vsel %vm457_vm3, %v456_v46, %v454_v29 }
 0x16f   : > { %432 = vst [vmem:[#allocation2] sm:$0xf0] %v428_v43  ;;  %433 = vst [vmem:[#allocation2 + $0x8] sm:$0xf0] %v429_v44  ;;  %v468_v50 = vmul.f32 %v463_v38, %v459_v48  ;;  %v469_v51 = vmul.f32 %v467_v41, %v458_v47  ;;  %v733_v43 = vld [vmem:[%s927_s7 + $0x18] ss:$0 sm:$0xff] }
 0x171   : > { %v472_v54 = vrot.slane %v468_v50, 4  ;;  %v473_v55 = vrot.slane %v469_v51, 4  ;;  %v391_v56 = vpop.permute.xlu1 %390  ;;  %v481_v60 = vpop.permute.xlu0 %480 }
 0x172   : > { %v395_v57 = vsel %vm394_vm4, %v389_v34, %v391_v56  ;;  %v396_v58 = vsel %vm394_vm4, %v391_v56, %v389_v34 }
 0x173   : > { %476 = vst [vmem:[#allocation2 + $0x10] sm:$0xf0] %v472_v54  ;;  %477 = vst [vmem:[#allocation2 + $0x18] sm:$0xf0] %v473_v55  ;;  %v405_v61 = vmul.f32 %v400_v52, %v396_v58  ;;  %v406_v62 = vmul.f32 %v404_v53, %v395_v57 }
 0x175   : > { %407 = vst [vmem:[#allocation2] sm:$0xf] %v405_v61  ;;  %408 = vst [vmem:[#allocation2 + $0x8] sm:$0xf] %v406_v62  ;;  %v437_v1 = vpop.permute.xlu1 %436  ;;  %v525_v9 = vpop.permute.xlu0 %524 }
 0x176   : > { %v439_v2 = vsel %vm438_vm5, %v435_v45, %v437_v1  ;;  %v440_v3 = vsel %vm438_vm5, %v437_v1, %v435_v45 }
 0x177   : > { %v449_v5 = vmul.f32 %v444_v59, %v440_v3  ;;  %v450_v6 = vmul.f32 %v448_v63, %v439_v2 }
 0x179   : > { %451 = vst [vmem:[#allocation2 + $0x10] sm:$0xf] %v449_v5  ;;  %452 = vst [vmem:[#allocation2 + $0x18] sm:$0xf] %v450_v6  ;;  %v483_v10 = vpop.permute.xlu1 %482  ;;  %v506_v23 = vpop.permute.xlu0 %505 }
 0x17a   : > { %v485_v11 = vsel %vm484_vm6, %v481_v60, %v483_v10  ;;  %v486_v12 = vsel %vm484_vm6, %v483_v10, %v481_v60  ;;  %v568_v60 = vld [vmem:[%s924_s4] sm:$0xf] }
 0x17b   : > { %v495_v14 = vmul.f32 %v490_v7, %v485_v11  ;;  %v496_v15 = vmul.f32 %v494_v8, %v486_v12 }
 0x17c   : > { %v570_v32 = vld [vmem:[#allocation2 + $0x8] sm:$0xff]  ;;  %v569_v34 = vld [vmem:[#allocation2] sm:$0xff] }
 0x17d   : > { %v499_v18 = vrot.slane %v495_v14, 4  ;;  %v500_v19 = vrot.slane %v496_v15, 4  ;;  %v527_v20 = vpop.permute.xlu1 %526  ;;  %v550_v44 = vpop.permute.xlu0 %549 }
 0x17e   : > { %v529_v21 = vsel %vm528_vm7, %v525_v9, %v527_v20  ;;  %v530_v22 = vsel %vm528_vm7, %v527_v20, %v525_v9 }
 0x17f   : > { %503 = vst [vmem:[#allocation2 + $0x20] sm:$0xf0] %v499_v18  ;;  %504 = vst [vmem:[#allocation2 + $0x28] sm:$0xf0] %v500_v19  ;;  %v539_v26 = vmul.f32 %v534_v13, %v529_v21  ;;  %v540_v29 = vmul.f32 %v538_v16, %v530_v22 }
 0x180   : > { %v572_v33 = vld [vmem:[#allocation2 + $0x18] sm:$0xff]  ;;  %v571_v24 = vld [vmem:[#allocation2 + $0x10] sm:$0xff] }
 0x181   : > { %v543_v35 = vrot.slane %v539_v26, 4  ;;  %v544_v36 = vrot.slane %v540_v29, 4  ;;  %v508_v37 = vpop.permute.xlu1 %507  ;;  %v580_v38 = vpack.c.bf16 %v572_v33, %v570_v32  ;;  %v579_v39 = vpack.c.bf16 %v571_v24, %v569_v34 }
 0x182   : > { %v510_v40 = vsel %vm509_vm8, %v506_v23, %v508_v37  ;;  %v511_v41 = vsel %vm509_vm8, %v508_v37, %v506_v23 }
 0x183   : > { %547 = vst [vmem:[#allocation2 + $0x30] sm:$0xf0] %v543_v35  ;;  %548 = vst [vmem:[#allocation2 + $0x38] sm:$0xf0] %v544_v36  ;;  %v520_v27 = vmul.f32 %v515_v30, %v510_v40  ;;  %v521_v42 = vmul.f32 %v519_v31, %v511_v41  ;;  %595 = vmatprep.subr.bf16.mxu1 %v580_v38 }
 0x184   : > { %596 = vmatpush1.bf16.msra.mxu1 %v579_v39 }
 0x185   : > { %522 = vst [vmem:[#allocation2 + $0x30] sm:$0xf] %v520_v27  ;;  %523 = vst [vmem:[#allocation2 + $0x38] sm:$0xf] %v521_v42  ;;  %v552_v45 = vpop.permute.xlu1 %551 }
 0x186   : > { %v554_v46 = vsel %vm553_vm9, %v550_v44, %v552_v45  ;;  %v555_v47 = vsel %vm553_vm9, %v552_v45, %v550_v44  ;;  %v574_v25 = vld [vmem:[#allocation2 + $0x28] sm:$0xff]  ;;  %v573_v51 = vld [vmem:[#allocation2 + $0x20] sm:$0xff] }
 0x187   : > { %v564_v48 = vmul.f32 %v732_v28, %v554_v46  ;;  %v565_v49 = vmul.f32 %v733_v43, %v555_v47 }
 0x189   : > { %566 = vst [vmem:[#allocation2 + $0x40] sm:$0xf] %v564_v48  ;;  %567 = vst [vmem:[#allocation2 + $0x48] sm:$0xf] %v565_v49 }
 0x18c   : > { %v576_v50 = vld [vmem:[#allocation2 + $0x38] sm:$0xff]  ;;  %v575_v52 = vld [vmem:[#allocation2 + $0x30] sm:$0xff] }
 0x18d   : > { %v582_v53 = vpack.c.bf16 %v576_v50, %v574_v25  ;;  %v581_v54 = vpack.c.bf16 %v575_v52, %v573_v51 }
 0x18e   : > { %v640_v61 = vpop.permute.xlu0 %639 }
 0x18f   : > { %597 = vmatprep.subr.bf16.mxu1 %v582_v53 }
 0x190   : > { %598 = vmatpush1.bf16.msra.mxu1 %v581_v54  ;;  %v578_v55 = vld [vmem:[#allocation2 + $0x48] sm:$0xf]  ;;  %v577_v56 = vld [vmem:[#allocation2 + $0x40] sm:$0xf] }
 0x191   : > { %v584_v57 = vpack.c.bf16 %v578_v55, %v578_v55  ;;  %v583_v58 = vpack.c.bf16 %v577_v56, %v577_v56 }
 0x193   : > { %734 = vmatprep.subr.msk.bf16.mxu1 %vm318_vm0, %v584_v57  ;;  %v590_v59 = vsel %vm318_vm0, %v583_v58, 0 }
 0x194   : > { %600 = vmatpush1.bf16.msra.mxu1 %v590_v59 }
 0x196   : > { %v648_v63 = vpop.permute.xlu1 %647 }
 0x197   : > { %735 = vmatmul.mubr.msk.bf16.vlgmr.msra.gmra.mrb[0].mxu1 %vm585_vm10, %v568_v60 }
 0x26a   : > { %v629_v62 = vpop.f32.mrb[0].mxu1 }
 0x26b   : > { %v642_v0 = vmul.f32 %v640_v61, %v629_v62  ;;  %v631_v1 = vpop.f32.mrb[1].mxu1 }
 0x26c   : > { %v643_v2 = vmul.f32 %v640_v61, %v631_v1  ;;  %v633_v3 = vpop.f32.mrb[2].mxu1 }
 0x26d   : > { %v650_v4 = vadd.f32 %v648_v63, %v642_v0  ;;  %v634_v5 = vpop.f32.mrb[3].mxu1 }
 0x26e   : > { %v651_v6 = vadd.f32 %v648_v63, %v643_v2 }
 0x26f   : > { %v652_v7 = vmax.f32 %v650_v4, 0.0 }
 0x270   : > { %v653_v8 = vmax.f32 %v651_v6, 0.0 }
 0x271   : > { %v658_v9 = vrot.slane %v652_v7, 4 }
 0x272   : > { %v659_v10 = vrot.slane %v653_v8, 4 }
 0x273   : > { %662 = vst [vmem:[%s842_s18 + $0x10] ss:$-12 sps:$4 sm:$0xff] %v658_v9  }
 0x274   : > { %663 = vst [vmem:[%s842_s18 + $0x18] ss:$-12 sps:$4 sm:$0xff] %v659_v10  }
 0x275 PF: > { %s18_s27 = sadd.s32 1, %s766_s27  }
 0x276   : > { %p15_p4 = scmp.ge.s32.totalorder %s18_s27, 4  }
 0x278   :  { %17 = sbr.rel (!%p15_p4) target bundleno = 1 (0x1), region = 82 }

</bundles_post_ra>
